<compile_context>
chip_gen: v7x
topology: tpu7x:2x2x1
jax: 0.10.0
libtpu: 0.0.40
codegen_flags: <defaults>
</compile_context>

<pallas_src>
import jax
import jax.numpy as jnp
import numpy as np
from jax.experimental import pallas as pl
from jax.experimental.pallas import tpu as pltpu

# ---- problem sizes (small, consistent with the module's forward) ----
B = 2            # batch
SEQ = 8          # sequence length (<= max_seq_len)
FEAT = 32        # feature_dim
MAX_SEQ_LEN = 70
EPS = 1e-7


def _attention_kernel(x_ref, w_ref, bias_ref, out_ref):
    # x_ref   : (B, S, F)  rnn_output
    # w_ref   : (1, 1, F)  attention_fc weight (row vector)
    # bias_ref: (1, S, 1)  fc bias + positional bias[:S], pre-summed in wrapper
    # out_ref : (B, F)
    x = x_ref[...]
    w = w_ref[...]

    # scores[b, s] = <x[b, s, :], w> + bias[s]   -> (B, S, 1)  (lane reduce over F)
    scores = jnp.sum(x * w, axis=-1, keepdims=True) + bias_ref[...]

    # tanh + exp go to the EUP
    aw = jnp.exp(jnp.tanh(scores))                        # (B, S, 1)
    denom = jnp.sum(aw, axis=1, keepdims=True) + EPS      # (B, 1, 1)
    aw = aw * pl.reciprocal(denom)                        # one reciprocal, then mul

    # attended[b, f] = sum_s aw[b, s] * x[b, s, f]
    out_ref[...] = jnp.sum(aw * x, axis=1)                # (B, F)


def attention_forward(rnn_output, fc_weight, fc_bias, bias_param):
    """rnn_output: (B, S, F) f32; fc_weight: (1, F); fc_bias: (1,);
    bias_param: (1, MAX_SEQ_LEN, 1)  ->  attended (B, F) f32."""
    b, s, f = rnn_output.shape
    w3 = fc_weight.reshape(1, 1, f).astype(jnp.float32)
    # The Linear bias and the positional bias are both added to the same
    # (B, S, 1) scores, so combine them once outside the kernel.
    bias3 = (bias_param[:, :s, :] + fc_bias[0]).astype(jnp.float32)

    vmem = pl.BlockSpec(memory_space=pltpu.MemorySpace.VMEM)
    return pl.pallas_call(
        _attention_kernel,
        out_shape=jax.ShapeDtypeStruct((b, f), jnp.float32),
        in_specs=[vmem, vmem, vmem],
        out_specs=vmem,
    )(rnn_output.astype(jnp.float32), w3, bias3)


def attention_reference(rnn_output, fc_weight, fc_bias, bias_param):
    """Pure-JAX replica of the PyTorch forward."""
    s = rnn_output.shape[1]
    aw = jnp.einsum("bsf,of->bso", rnn_output, fc_weight) + fc_bias
    aw = bias_param[:, :s, :] + aw
    aw = jnp.tanh(aw)
    aw = jnp.exp(aw)
    aw = aw / (jnp.sum(aw, axis=1, keepdims=True) + EPS)
    return jnp.sum(aw * rnn_output, axis=1)


if __name__ == "__main__":
    key = jax.random.PRNGKey(0)
    kx, kw, kb, kp = jax.random.split(key, 4)

    x = jax.random.normal(kx, (B, SEQ, FEAT), dtype=jnp.float32)
    # nn.Linear(feature_dim, 1)-style parameters
    fc_weight = (1.0 / np.sqrt(FEAT)) * jax.random.normal(kw, (1, FEAT), dtype=jnp.float32)
    fc_bias = (1.0 / np.sqrt(FEAT)) * jax.random.normal(kb, (1,), dtype=jnp.float32)
    # the module initializes this to zeros; use small random values so the
    # bias-slicing / add path is actually exercised by the check
    bias_param = 0.1 * jax.random.normal(kp, (1, MAX_SEQ_LEN, 1), dtype=jnp.float32)

    out = jax.block_until_ready(attention_forward(x, fc_weight, fc_bias, bias_param))
    ref = jax.block_until_ready(attention_reference(x, fc_weight, fc_bias, bias_param))

    np.testing.assert_allclose(np.asarray(out), np.asarray(ref), rtol=1e-4, atol=1e-4)
    print("KERNEL_OK")
</pallas_src>

<mosaic_0001>
module attributes {stable_mosaic.version = 11 : i64} {
  func.func @_attention_kernel(%arg0: memref<2x8x32xf32, #tpu.memory_space<vmem>>, %arg1: memref<1x1x32xf32, #tpu.memory_space<vmem>>, %arg2: memref<1x8x1xf32, #tpu.memory_space<vmem>>, %arg3: memref<2x32xf32, #tpu.memory_space<vmem>>) attributes {dimension_semantics = [], scalar_prefetch = 0 : i64, scratch_operands = 0 : i64, tpu.core_type = #tpu.core_type<tc>} {
    %c0 = arith.constant 0 : index
    %c0_0 = arith.constant 0 : index
    %c0_1 = arith.constant 0 : index
    %0 = vector.load %arg0[%c0, %c0_0, %c0_1] : memref<2x8x32xf32, #tpu.memory_space<vmem>>, vector<2x8x32xf32>
    %c0_2 = arith.constant 0 : index
    %c0_3 = arith.constant 0 : index
    %c0_4 = arith.constant 0 : index
    %1 = vector.load %arg1[%c0_2, %c0_3, %c0_4] : memref<1x1x32xf32, #tpu.memory_space<vmem>>, vector<1x1x32xf32>
    %2 = vector.broadcast %1 : vector<1x1x32xf32> to vector<2x8x32xf32>
    %3 = arith.mulf %0, %2 : vector<2x8x32xf32>
    %cst = arith.constant dense<0.000000e+00> : vector<2x8xf32>
    %4 = vector.multi_reduction <add>, %3, %cst [2] : vector<2x8x32xf32> to vector<2x8xf32>
    %5 = vector.shape_cast %4 : vector<2x8xf32> to vector<2x8x1xf32>
    %c0_5 = arith.constant 0 : index
    %c0_6 = arith.constant 0 : index
    %c0_7 = arith.constant 0 : index
    %6 = vector.load %arg2[%c0_5, %c0_6, %c0_7] : memref<1x8x1xf32, #tpu.memory_space<vmem>>, vector<1x8x1xf32>
    %7 = vector.broadcast %6 : vector<1x8x1xf32> to vector<2x8x1xf32>
    %8 = arith.addf %5, %7 : vector<2x8x1xf32>
    %9 = math.tanh %8 : vector<2x8x1xf32>
    %10 = math.exp %9 : vector<2x8x1xf32>
    %cst_8 = arith.constant dense<0.000000e+00> : vector<2x1xf32>
    %11 = vector.multi_reduction <add>, %10, %cst_8 [1] : vector<2x8x1xf32> to vector<2x1xf32>
    %12 = vector.shape_cast %11 : vector<2x1xf32> to vector<2x1x1xf32>
    %cst_9 = arith.constant 1.000000e-07 : f32
    %13 = vector.broadcast %cst_9 : f32 to vector<2x1x1xf32>
    %14 = arith.addf %12, %13 : vector<2x1x1xf32>
    %15 = tpu.reciprocal %14 : vector<2x1x1xf32> -> vector<2x1x1xf32>
    %16 = vector.broadcast %15 : vector<2x1x1xf32> to vector<2x8x1xf32>
    %17 = arith.mulf %10, %16 : vector<2x8x1xf32>
    %18 = vector.broadcast %17 : vector<2x8x1xf32> to vector<2x8x32xf32>
    %19 = arith.mulf %18, %0 : vector<2x8x32xf32>
    %cst_10 = arith.constant dense<0.000000e+00> : vector<2x32xf32>
    %20 = vector.multi_reduction <add>, %19, %cst_10 [1] : vector<2x8x32xf32> to vector<2x32xf32>
    %c0_11 = arith.constant 0 : index
    %c0_12 = arith.constant 0 : index
    %21 = vector.load %arg3[%c0_11, %c0_12] : memref<2x32xf32, #tpu.memory_space<vmem>>, vector<2x32xf32>
    tpu.vector_store %arg3[%c0_11, %c0_12], %20 {strides = array<i32>} : memref<2x32xf32, #tpu.memory_space<vmem>>, vector<2x32xf32>,
    return
  }
}

</mosaic_0001>

<bundles_post_ra>
// kernel: tpu_custom_call.1
= control target key start
LH: loop header
LB: loop body
LE: loop exit
PB: predicated region body
PF: predicated region fallthrough
CT: control target
= control target key end

     0   :  { %8 = vsyncpa [#allocation3], 0  ;;  %s252_s0 = inlined_call_operand.hbm [shape: f32[2,8,32], index: 0, kind: input, shape index: {}]   ;;  %s253_s1 = inlined_call_operand.vmem [shape: f32[1,1,32], index: 1, kind: input, shape index: {}]   ;;  %s254_s2 = inlined_call_operand.vmem [shape: f32[1,8,1], index: 2, kind: input, shape index: {}]   ;;  %s255_s3 = inlined_call_operand.hbm [shape: f32[2,32], index: 3, kind: output, shape index: {}]  }
   0x1   :  { %9 = vsyncpa [#allocation4], 0  ;;  %s193_s12 = smov [#allocation2]   ;;  %s145_s16 = scalar_lea.hbm %s252_s0, 256 }
   0x2   :  { %s15_s13 = sshll.u32 %s193_s12, 4  ;;  %p146_p0 = scmp.ne.s32.totalorder %s252_s0, %s145_s16  ;;  %s16_s13 = int_to_ptr.vmem [resolvable:$true] %s15_s13 }
   0x3   :  { %p149_p1 = scmp.lt.u32.totalorder %s145_s16, %s252_s0 }
   0x5   :  { %p151_p2 = pnand %p149_p1, %p146_p0 }
   0x7   :  { %154 = shalt.err (!%p151_p2)
}
   0x8   :  { %s155_s21 = scalar_lea.vmem %s16_s13, 256  ;;  %p160_p4 = scmp.lt.s32.totalorder %s16_s13, %s16_s13 }
   0x9   :  { %p156_p3 = scmp.ne.s32.totalorder %s16_s13, %s155_s21  ;;  %p161_p5 = scmp.lt.s32.totalorder %s155_s21, %s155_s21 }
   0xb   :  { %p162_p6 = por %p161_p5, %p160_p4 }
   0xd   :  { %p163_p7 = pnand %p162_p6, %p156_p3 }
   0xf   :  { %166 = shalt.err (!%p163_p7)
}
  0x10   :  { %s194_s22 = smov 128   ;;  %s195_s23 = smov 8  }
  0x11   :  { %21 = dma.hbm_to_vmem [thread:$0]  %s252_s0, 256, %s16_s13, [#allocation3], %s194_s22, %s194_s22, %s195_s23  }
  0x12   :  { %189 = dma.done.wait [#allocation3], 256  }
  0x13   :  { %190 = vsyncadd [#allocation3], 4294967040  ;;  %v29_v0 = vld [vmem:[#allocation2] sm:$0xff]  ;;  %vm40_vm0 = vcmask 261120   ;;  %v30_v2 = vld [vmem:[#allocation2 + $0x8] sm:$0xff]  ;;  %v196_v7 = vmov 0  }
  0x14   :  { %v125_v1 = vld [vmem:[%s253_s1] ss:$0 sm:$0xff]  ;;  %131 = vset.pattern.permute.xlu1 %v196_v7  ;;  %132 = vset.pattern.permute.xlu0 %v196_v7  ;;  %vm56_vm1 = vcmask 7168   ;;  %s197_s1 = smov [#allocation5]   ;;  %vm105_vm2 = vcmask 1041409   ;;  %vm108_vm3 = vcmask 254976  }
  0x15   :  { %v38_v3 = vmul.f32 %v125_v1, %v29_v0  ;;  %v39_v4 = vmul.f32 %v125_v1, %v30_v2  ;;  %v47_v8 = vld [vmem:[%s254_s2] sm:$0xff]  ;;  %s116_s2 = sshll.u32 %s197_s1, 4  ;;  %s117_s2 = int_to_ptr.vmem [resolvable:$true] %s116_s2 }
  0x16   :  { %s167_s29 = scalar_lea.vmem %s117_s2, 32  ;;  %p172_p9 = scmp.lt.s32.totalorder %s117_s2, %s117_s2 }
  0x17   :  { %v41_v5 = vsel %vm40_vm0, %v38_v3, 0.0  ;;  %v44_v6 = vsel %vm40_vm0, %v39_v4, 0.0  ;;  %p168_p8 = scmp.ne.s32.totalorder %s117_s2, %s167_s29  ;;  %p173_p10 = scmp.lt.s32.totalorder %s167_s29, %s167_s29 }
  0x18   :  { %42 = vadd.xlane.f32.xlu0 %v41_v5 }
  0x19   :  { %p174_p11 = por %p173_p10, %p172_p9 }
  0x1b   :  { %p175_p12 = pnand %p174_p11, %p168_p8 }
  0x1c   :  { %45 = vadd.xlane.f32.xlu0 %v44_v6 }
  0xa5   :  { %v43_v9 = vpop.xlane.xlu0 %42 }
  0xa6   :  { %v48_v10 = vadd.f32 %v47_v8, %v43_v9 }
  0xa8   :  { %133 = vtanh.f32 %v48_v10 }
  0xa9   :  { %v46_v11 = vpop.xlane.xlu0 %45 }
  0xaa   :  { %v49_v12 = vadd.f32 %v47_v8, %v46_v11 }
  0xac   :  { %135 = vtanh.f32 %v49_v12 }
  0xb2   :  { %v134_v13 = vpop.eup %133 }
  0xb3   :  { %v52_v14 = vmul.f32 1.442695, %v134_v13 }
  0xb5   :  { %137 = vpow2.f32 %v52_v14 }
  0xb6   :  { %v136_v15 = vpop.eup %135 }
  0xb7   :  { %v54_v16 = vmul.f32 1.442695, %v136_v15 }
  0xb9   :  { %139 = vpow2.f32 %v54_v16 }
  0xbf   :  { %v138_v17 = vpop.eup %137 }
  0xc0   :  { %v57_v18 = vsel %vm56_vm1, %v138_v17, 0.0 }
  0xc1   :  { %v58_v19 = vrot.slane %v57_v18, 4 }
  0xc3   :  { %v140_v20 = vpop.eup %139  ;;  %v59_v21 = vadd.f32 %v58_v19, %v57_v18 }
  0xc4   :  { %v64_v22 = vsel %vm56_vm1, %v140_v20, 0.0 }
  0xc5   :  { %v65_v23 = vrot.slane %v64_v22, 4  ;;  %v60_v24 = vrot.slane %v59_v21, 2 }
  0xc7   :  { %v66_v25 = vadd.f32 %v65_v23, %v64_v22  ;;  %v61_v26 = vadd.f32 %v60_v24, %v59_v21 }
  0xc9   :  { %v67_v27 = vrot.slane %v66_v25, 2  ;;  %v62_v28 = vrot.slane %v61_v26, 1 }
  0xcb   :  { %v63_v29 = vadd.f32 %v62_v28, %v61_v26  ;;  %v68_v30 = vadd.f32 %v67_v27, %v66_v25 }
  0xcd   :  { %v71_v31 = vadd.f32 1e-07, %v63_v29  ;;  %v69_v32 = vrot.slane %v68_v30, 1 }
  0xcf   :  { %141 = vrcp.f32 %v71_v31  ;;  %v70_v33 = vadd.f32 %v69_v32, %v68_v30 }
  0xd1   :  { %v72_v34 = vadd.f32 1e-07, %v70_v33 }
  0xd3   :  { %143 = vrcp.f32 %v72_v34 }
  0xd9   :  { %v142_v35 = vpop.eup %141 }
  0xda   :  { %v75_v36 = vmul.f32 %v142_v35, %v138_v17 }
  0xdc   :  { %79 = vperm.xlu1 %131, %v75_v36  }
  0xdd   :  { %v144_v37 = vpop.eup %143 }
  0xde   :  { %v76_v38 = vmul.f32 %v144_v37, %v140_v20 }
  0xe0   :  { %84 = vperm.xlu1 %131, %v76_v38  }
 0x15b   :  { %v80_v39 = vpop.permute.xlu1 %79 }
 0x15c   :  { %v87_v40 = vmul.f32 %v80_v39, %v29_v0 }
 0x15e   :  { %v89_v41 = vsel %vm40_vm0, %v87_v40, 0.0 }
 0x15f   :  { %v90_v42 = vrot.slane %v89_v41, 4  ;;  %v85_v43 = vpop.permute.xlu1 %84 }
 0x160   :  { %v88_v44 = vmul.f32 %v85_v43, %v30_v2 }
 0x161   :  { %v91_v45 = vadd.f32 %v90_v42, %v89_v41 }
 0x162   :  { %v96_v46 = vsel %vm40_vm0, %v88_v44, 0.0 }
 0x163   :  { %v92_v47 = vrot.slane %v91_v45, 2  ;;  %v97_v48 = vrot.slane %v96_v46, 4 }
 0x165   :  { %v93_v49 = vadd.f32 %v92_v47, %v91_v45  ;;  %v98_v50 = vadd.f32 %v97_v48, %v96_v46 }
 0x167   :  { %v99_v51 = vrot.slane %v98_v50, 2  ;;  %v94_v52 = vrot.slane %v93_v49, 1 }
 0x169   :  { %v100_v53 = vadd.f32 %v99_v51, %v98_v50  ;;  %v95_v55 = vadd.f32 %v94_v52, %v93_v49 }
 0x16b   :  { %v101_v54 = vrot.slane %v100_v53, 1 }
 0x16d   :  { %v102_v56 = vadd.f32 %v101_v54, %v100_v53 }
 0x16f   :  { %v106_v57 = vsel %vm105_vm2, %v102_v56, %v95_v55 }
 0x170   :  { %109 = vst.msk [vmem:[#allocation5] sm:$0x3] %vm108_vm3, %v106_v57 }
 0x171   :  { %178 = shalt.err (!%p175_p12)
}
 0x172   :  { %s179_s5 = scalar_lea.hbm %s255_s3, 32 }
 0x173   :  { %p180_p13 = scmp.ne.s32.totalorder %s255_s3, %s179_s5  ;;  %p183_p0 = scmp.lt.u32.totalorder %s179_s5, %s255_s3 }
 0x175   :  { %p185_p1 = pnand %p183_p0, %p180_p13 }
 0x177   :  { %188 = shalt.err (!%p185_p1)
}
 0x178   :  { %119 = dma.vmem_to_hbm [thread:$0]  %s117_s2, 32, %s255_s3, [#allocation4]  }
 0x179   :  { %191 = dma.done.wait [#allocation4], 32  }
 0x17a   :  { %192 = vsyncadd [#allocation4], 4294967264 }
 0x17b   :  { %123 = vsyncpa [#allocation3], 1 }
 0x17c   :  { %124 = vsyncpa [#allocation4], 1 }

</bundles_post_ra>
